<compile_context>
chip_gen: v7x
topology: tpu7x:2x2x1
jax: 0.10.0
libtpu: 0.0.40
codegen_flags: <defaults>
</compile_context>

<pallas_src>
import jax
import jax.numpy as jnp
from jax.experimental import pallas as pl
from jax.experimental.pallas import tpu as pltpu


# ----------------------------------------------------------------------------
# Tiling constants / helpers
# ----------------------------------------------------------------------------
_ROW_CAP = 512            # sublane tile cap (multiple of 32 -> int8 mask packs cleanly)
_COL_CAP = 1024           # lane tile cap   (multiple of 128 -> unmasked interior stores)
# Worst case (f32 data + f32 mask + f32 out, 512x1024 tiles, double buffered)
#   2 * (2 + 2 + 2) MiB + 2 MiB f32 scratch = 14 MiB  -> comfortable under the
#   32 MiB scoped-VMEM default and under ~48 MiB per v7x TensorCore.
_VMEM_LIMIT = 32 * 1024 * 1024
_PALLAS_MIN_ELEMS = 1 << 20   # below this, let XLA fuse the multiply instead


def _tile(dim: int, base: int, cap: int) -> int:
    """Full dim when it fits (always a legal block), else the cap (a multiple
    of `base`); pl.cdiv grids handle the ragged last block."""
    if dim <= cap:
        return dim
    return (cap // base) * base


def _prep_mask(mask: jax.Array) -> jax.Array:
    # No wrapper-side dtype cast (it would add a full HBM pass).  Only bool is
    # normalised to int8 (same 1 byte/elem) for robust lowering.
    if mask.dtype == jnp.bool_:
        return mask.astype(jnp.int8)
    return mask


def _compiler_params(dim_sem):
    return pltpu.CompilerParams(
        dimension_semantics=dim_sem,
        vmem_limit_bytes=_VMEM_LIMIT,
    )


# ----------------------------------------------------------------------------
# Pallas kernels
# ----------------------------------------------------------------------------
def _masked_forward_kernel(x_ref, m_ref, o_ref):
    # out = data * mask ; mask cast to data dtype in-kernel (free VPU work on
    # an HBM-bandwidth-bound kernel).
    o_ref[...] = x_ref[...] * m_ref[...].astype(x_ref.dtype)


def _masked_accumulate_kernel(x_ref, m_ref, o_ref, acc_ref):
    # Fused predict(): accumulate batch k's masked forward into an f32 VMEM
    # scratch (exact even for bf16 data).  Batch is the innermost
    # ("arbitrary") grid axis; the output is stored to HBM exactly once.
    k = pl.program_id(2)

    @pl.when(k == 0)
    def _():
        acc_ref[...] = jnp.zeros_like(acc_ref)

    acc_ref[...] += (x_ref[...] * m_ref[...].astype(x_ref.dtype)).astype(jnp.float32)

    @pl.when(k == pl.num_programs(2) - 1)
    def _():
        o_ref[...] = acc_ref[...].astype(o_ref.dtype)


# ----------------------------------------------------------------------------
# Wrappers
# ----------------------------------------------------------------------------
def masked_forward(data: jax.Array, mask: jax.Array, use_pallas=None) -> jax.Array:
    """Masked forward hot path: out = data * mask, tiled + pipelined.

    data: (N, D) float; mask: (N, D) missingness indicator (any dtype)."""
    assert data.shape == mask.shape and data.ndim == 2
    n, d = data.shape
    if use_pallas is None:
        use_pallas = (n * d) >= _PALLAS_MIN_ELEMS
    if not use_pallas:
        # Small shapes: let XLA fuse the multiply with neighbouring ops.
        return data * mask.astype(data.dtype)

    m = _prep_mask(mask)
    tm = _tile(n, 32, _ROW_CAP)
    tn = _tile(d, 128, _COL_CAP)
    grid = (pl.cdiv(n, tm), pl.cdiv(d, tn))

    return pl.pallas_call(
        _masked_forward_kernel,
        out_shape=jax.ShapeDtypeStruct((n, d), data.dtype),
        grid_spec=pltpu.PrefetchScalarGridSpec(
            num_scalar_prefetch=0,
            grid=grid,
            in_specs=[
                pl.BlockSpec((tm, tn), lambda i, j: (i, j)),
                pl.BlockSpec((tm, tn), lambda i, j: (i, j)),
            ],
            out_specs=pl.BlockSpec((tm, tn), lambda i, j: (i, j)),
        ),
        compiler_params=_compiler_params(("parallel", "parallel")),
    )(data, m)


def masked_predict(data: jax.Array, mask: jax.Array, use_pallas=None) -> jax.Array:
    """Fused AbstractModel.predict: sum_b forward(data[b], mask[b]).

    data, mask: (B, N, D).  Batch accumulation happens inside the kernel in an
    f32 VMEM scratch (batch axis = innermost 'arbitrary' grid axis, constant
    output index_map), so each batch is read from HBM once and the output is
    written once."""
    assert data.shape == mask.shape and data.ndim == 3
    b, n, d = data.shape
    if use_pallas is None:
        use_pallas = (b * n * d) >= _PALLAS_MIN_ELEMS
    if not use_pallas:
        return jnp.sum(data * mask.astype(data.dtype), axis=0)

    m = _prep_mask(mask)
    tm = _tile(n, 32, _ROW_CAP)
    tn = _tile(d, 128, _COL_CAP)
    # v7x: the 'parallel' (i, j) axes shard across the 2 TensorCores.  If the
    # whole output fits in a single tile, split the row axis (multiple of 32
    # so int8 masks keep native packing) so both cores get work.
    if pl.cdiv(n, tm) * pl.cdiv(d, tn) == 1 and n >= 64:
        tm = ((pl.cdiv(n, 2) + 31) // 32) * 32
    grid = (pl.cdiv(n, tm), pl.cdiv(d, tn), b)   # reduction (batch) axis last

    return pl.pallas_call(
        _masked_accumulate_kernel,
        out_shape=jax.ShapeDtypeStruct((n, d), data.dtype),
        grid_spec=pltpu.PrefetchScalarGridSpec(
            num_scalar_prefetch=0,
            grid=grid,
            in_specs=[
                pl.BlockSpec((None, tm, tn), lambda i, j, k: (k, i, j)),
                pl.BlockSpec((None, tm, tn), lambda i, j, k: (k, i, j)),
            ],
            out_specs=pl.BlockSpec((tm, tn), lambda i, j, k: (i, j)),
            scratch_shapes=[pltpu.VMEM((tm, tn), jnp.float32)],
        ),
        compiler_params=_compiler_params(("parallel", "parallel", "arbitrary")),
    )(data, m)


# ----------------------------------------------------------------------------
# Plain-JAX glue mirroring AbstractModel helpers
# ----------------------------------------------------------------------------
def process_column(x: jax.Array, m: jax.Array):
    """AbstractModel._process_column, non-categorical branch:
    x.view(-1, 1), m.view(-1, 1)."""
    # TODO(synk): categorical branch (Conversion._encode_categorical) depends
    # on an external class not defined in the reference module.
    return x.reshape(-1, 1), m.reshape(-1, 1)


def predict(batches, use_pallas=None):
    """AbstractModel.predict: run the forward per batch and accumulate with
    `+=`.  Preferred input is a pre-stacked (data, mask) pair of (B, N, D)
    arrays (no extra HBM copy); a list of equal-shaped (data, mask) batches is
    also accepted for API compatibility (costs one stack pass)."""
    if isinstance(batches, tuple) and len(batches) == 2 and hasattr(batches[0], "ndim"):
        data, mask = batches
        return masked_predict(data, mask, use_pallas=use_pallas)
    if not batches:
        raise Exception("No data was provided to the model.")
    datas, masks = zip(*batches)
    if not all(x.shape == datas[0].shape for x in datas):
        raise Exception("predict() requires equal-shaped batches (as the "
                        "reference `outputs += tmp` does).")
    # NOTE: jnp.stack costs a full extra HBM pass; prefer pre-stacked inputs.
    return masked_predict(jnp.stack(datas), jnp.stack(masks), use_pallas=use_pallas)


# ----------------------------------------------------------------------------
# Main
# ----------------------------------------------------------------------------
if __name__ == "__main__":
    key = jax.random.PRNGKey(0)
    k_data, k_mask = jax.random.split(key)

    # Small tabular-style shapes: B batches of N rows with D features.
    # N=200 / D=96 exercise the ragged-block (non-multiple-of-(8,128)) path.
    B, N, D = 3, 200, 96
    data = jax.random.normal(k_data, (B, N, D), dtype=jnp.float32)
    # Upstream missingness indicator as int8 {0,1}: consumed as-is by the
    # kernel (1 B/elem of HBM), no wrapper-side cast.
    mask_i8 = (jax.random.uniform(k_mask, (B, N, D)) > 0.3).astype(jnp.int8)
    mask_f32 = mask_i8.astype(jnp.float32)

    # Single forward pass (force the kernel even at demo size; the wrapper
    # would otherwise let XLA fuse the multiply).
    out = masked_forward(data[0], mask_i8[0], use_pallas=True)
    out = jax.block_until_ready(out)
    ref0 = data[0] * mask_f32[0]
    assert out.shape == (N, D)
    assert jnp.allclose(out, ref0, atol=1e-6), "masked_forward (int8 mask) mismatch"

    # f32-mask path (no dtype munging either way).
    out_f = jax.block_until_ready(masked_forward(data[0], mask_f32[0], use_pallas=True))
    assert jnp.allclose(out_f, ref0, atol=1e-6), "masked_forward (f32 mask) mismatch"

    # Fused predict-style accumulation over B batches; pre-stacked input so no
    # jnp.stack copy.  Accumulates in an f32 VMEM scratch inside the kernel.
    acc = predict((data, mask_i8), use_pallas=True)
    acc = jax.block_until_ready(acc)
    ref_acc = jnp.sum(data * mask_f32, axis=0)
    assert acc.shape == (N, D)
    assert jnp.allclose(acc, ref_acc, atol=1e-5, rtol=1e-5), "predict mismatch"

    # Exercise the _process_column-style reshape glue.
    x_col, m_col = process_column(data[0, :, 0], mask_f32[0, :, 0])
    assert x_col.shape == (N, 1) and m_col.shape == (N, 1)

    print("KERNEL_OK")
</pallas_src>

<mosaic_0001>
module attributes {stable_mosaic.version = 11 : i64} {
  func.func @_masked_forward_kernel(%arg0: i32, %arg1: i32, %arg2: memref<200x96xf32, #tpu.memory_space<vmem>>, %arg3: memref<200x96xi8, #tpu.memory_space<vmem>>, %arg4: memref<200x96xf32, #tpu.memory_space<vmem>>) attributes {dimension_semantics = [#tpu.dimension_semantics<parallel>, #tpu.dimension_semantics<parallel>], iteration_bounds = array<i64: 1, 1>, scalar_prefetch = 0 : i64, scratch_operands = 0 : i64, tpu.core_type = #tpu.core_type<tc>, window_params = [{transform_indices = @transform_0, window_bounds = array<i64: 200, 96>}, {transform_indices = @transform_1, window_bounds = array<i64: 200, 96>}, {transform_indices = @transform_2, window_bounds = array<i64: 200, 96>}]} {
    %c0 = arith.constant 0 : index
    %c0_0 = arith.constant 0 : index
    %0 = vector.load %arg2[%c0, %c0_0] : memref<200x96xf32, #tpu.memory_space<vmem>>, vector<200x96xf32>
    %c0_1 = arith.constant 0 : index
    %c0_2 = arith.constant 0 : index
    %1 = vector.load %arg3[%c0_1, %c0_2] : memref<200x96xi8, #tpu.memory_space<vmem>>, vector<200x96xi8>
    %2 = arith.sitofp %1 : vector<200x96xi8> to vector<200x96xf32>
    %3 = arith.mulf %0, %2 : vector<200x96xf32>
    %c0_3 = arith.constant 0 : index
    %c0_4 = arith.constant 0 : index
    %4 = vector.load %arg4[%c0_3, %c0_4] : memref<200x96xf32, #tpu.memory_space<vmem>>, vector<200x96xf32>
    tpu.vector_store %arg4[%c0_3, %c0_4], %3 {strides = array<i32>} : memref<200x96xf32, #tpu.memory_space<vmem>>, vector<200x96xf32>,
    return
  }
  func.func @transform_0(%arg0: i32, %arg1: i32) -> (i32, i32) {
    %c0_i32 = arith.constant 0 : i32
    return %arg0, %arg1 : i32, i32
  }
  func.func @transform_1(%arg0: i32, %arg1: i32) -> (i32, i32) {
    %c0_i32 = arith.constant 0 : i32
    return %arg0, %arg1 : i32, i32
  }
  func.func @transform_2(%arg0: i32, %arg1: i32) -> (i32, i32) {
    %c0_i32 = arith.constant 0 : i32
    return %arg0, %arg1 : i32, i32
  }
}

</mosaic_0001>

<bundles_post_ra>
// kernel: tpu_custom_call.1
= control target key start
LH: loop header
LB: loop body
LE: loop exit
PB: predicated region body
PF: predicated region fallthrough
CT: control target
= control target key end

     0   :  { %vm136_vm0 = vcmask 785408   ;;  %s436_s0 = inlined_call_operand.vmem [shape: f32[200,96], index: 0, kind: input, shape index: {}]   ;;  %s437_s1 = inlined_call_operand.vmem [shape: s8[200,96], index: 1, kind: input, shape index: {}]   ;;  %s438_s2 = inlined_call_operand.vmem [shape: f32[200,96], index: 2, kind: output, shape index: {}]  }
   0x1   :  { %v167_v0 = vld [vmem:[%s437_s1] sm:$0xff]   ;;  %v12_v3 = vld [vmem:[%s436_s0 + $0x8] sm:$0xff]  ;;  %v13_v7 = vld [vmem:[%s436_s0 + $0x10] sm:$0xff] }
   0x2   :  { %v11_v1 = vld [vmem:[%s436_s0] sm:$0xff]  ;;  %v168_v2 = vunpack.c.0.s8 %v167_v0  ;;  %v169_v4 = vunpack.c.1.s8 %v167_v0  ;;  %v172_v5 = vunpack.c.2.s8 %v167_v0  ;;  %v173_v6 = vunpack.c.3.s8 %v167_v0  ;;  %v14_v8 = vld [vmem:[%s436_s0 + $0x18] sm:$0xff]  ;;  %v215_v9 = vld [vmem:[%s437_s1 + $0x8] sm:$0xff]  }
   0x3   :  { %v15_v14 = vld [vmem:[%s436_s0 + $0x20] sm:$0xff]  ;;  %v176_v15 = vunpack.c.0.s8 %v215_v9  ;;  %v177_v16 = vunpack.c.1.s8 %v215_v9  ;;  %v180_v17 = vunpack.c.2.s8 %v215_v9  ;;  %v181_v18 = vunpack.c.3.s8 %v215_v9  ;;  %v217_v19 = vld [vmem:[%s437_s1 + $0x10] sm:$0xff]   ;;  %v16_v24 = vld [vmem:[%s436_s0 + $0x28] sm:$0xff] }
   0x4   :  { %v86_v10 = vcvt.s32.f32 %v168_v2  ;;  %v87_v11 = vcvt.s32.f32 %v169_v4  ;;  %v88_v12 = vcvt.s32.f32 %v172_v5  ;;  %v89_v13 = vcvt.s32.f32 %v173_v6  ;;  %v17_v25 = vld [vmem:[%s436_s0 + $0x30] sm:$0xff]  ;;  %v18_v26 = vld [vmem:[%s436_s0 + $0x38] sm:$0xff]  ;;  %v19_v31 = vld [vmem:[%s436_s0 + $0x40] sm:$0xff] }
   0x5   :  { %v90_v27 = vcvt.s32.f32 %v176_v15  ;;  %v91_v28 = vcvt.s32.f32 %v177_v16  ;;  %v92_v29 = vcvt.s32.f32 %v180_v17  ;;  %v93_v30 = vcvt.s32.f32 %v181_v18  ;;  %v219_v36 = vld [vmem:[%s437_s1 + $0x18] sm:$0xff]   ;;  %v20_v41 = vld [vmem:[%s436_s0 + $0x48] sm:$0xff]  ;;  %v21_v42 = vld [vmem:[%s436_s0 + $0x50] sm:$0xff] }
   0x6   :  { %v111_v20 = vmul.f32 %v86_v10, %v11_v1  ;;  %v112_v21 = vmul.f32 %v87_v11, %v12_v3  ;;  %v113_v22 = vmul.f32 %v88_v12, %v13_v7  ;;  %v114_v23 = vmul.f32 %v89_v13, %v14_v8  ;;  %v22_v43 = vld [vmem:[%s436_s0 + $0x58] sm:$0xff]  ;;  %v23_v48 = vld [vmem:[%s436_s0 + $0x60] sm:$0xff]  ;;  %v24_v58 = vld [vmem:[%s436_s0 + $0x68] sm:$0xff] }
   0x7   :  { %v184_v32 = vunpack.c.0.s8 %v217_v19  ;;  %v185_v33 = vunpack.c.1.s8 %v217_v19  ;;  %v188_v34 = vunpack.c.2.s8 %v217_v19  ;;  %v189_v35 = vunpack.c.3.s8 %v217_v19  ;;  %v221_v53 = vld [vmem:[%s437_s1 + $0x20] sm:$0xff]   ;;  %v25_v59 = vld [vmem:[%s436_s0 + $0x70] sm:$0xff]  ;;  %v26_v60 = vld [vmem:[%s436_s0 + $0x78] sm:$0xff] }
   0x8   :  { %137 = vst.msk [vmem:[%s438_s2] sm:$0xff] %vm136_vm0, %v111_v20  ;;  %138 = vst.msk [vmem:[%s438_s2 + $0x8] sm:$0xff] %vm136_vm0, %v112_v21  ;;  %v115_v37 = vmul.f32 %v90_v27, %v15_v14  ;;  %v116_v38 = vmul.f32 %v91_v28, %v16_v24  ;;  %v117_v39 = vmul.f32 %v92_v29, %v17_v25  ;;  %v192_v49 = vunpack.c.0.s8 %v219_v36  ;;  %v27_v1 = vld [vmem:[%s436_s0 + $0x80] sm:$0xff]  ;;  %v223_v6 = vld [vmem:[%s437_s1 + $0x28] sm:$0xff]  }
   0x9   :  { %139 = vst.msk [vmem:[%s438_s2 + $0x10] sm:$0xff] %vm136_vm0, %v113_v22  ;;  %140 = vst.msk [vmem:[%s438_s2 + $0x18] sm:$0xff] %vm136_vm0, %v114_v23  ;;  %v118_v40 = vmul.f32 %v93_v30, %v18_v26  ;;  %v94_v44 = vcvt.s32.f32 %v184_v32  ;;  %v95_v45 = vcvt.s32.f32 %v185_v33  ;;  %v96_v46 = vcvt.s32.f32 %v188_v34  ;;  %v28_v11 = vld [vmem:[%s436_s0 + $0x88] sm:$0xff]  ;;  %v29_v12 = vld [vmem:[%s436_s0 + $0x90] sm:$0xff] }
   0xa   :  { %v97_v47 = vcvt.s32.f32 %v189_v35  ;;  %141 = vst.msk [vmem:[%s438_s2 + $0x20] sm:$0xff] %vm136_vm0, %v115_v37  ;;  %142 = vst.msk [vmem:[%s438_s2 + $0x28] sm:$0xff] %vm136_vm0, %v116_v38  ;;  %v193_v50 = vunpack.c.1.s8 %v219_v36  ;;  %v196_v51 = vunpack.c.2.s8 %v219_v36  ;;  %v197_v52 = vunpack.c.3.s8 %v219_v36  ;;  %v30_v13 = vld [vmem:[%s436_s0 + $0x98] sm:$0xff]  ;;  %v31_v18 = vld [vmem:[%s436_s0 + $0xa0] sm:$0xff] }
   0xb   :  { %143 = vst.msk [vmem:[%s438_s2 + $0x30] sm:$0xff] %vm136_vm0, %v117_v39  ;;  %144 = vst.msk [vmem:[%s438_s2 + $0x38] sm:$0xff] %vm136_vm0, %v118_v40  ;;  %v119_v54 = vmul.f32 %v94_v44, %v19_v31  ;;  %v120_v55 = vmul.f32 %v95_v45, %v20_v41  ;;  %v121_v56 = vmul.f32 %v96_v46, %v21_v42  ;;  %v98_v61 = vcvt.s32.f32 %v192_v49  ;;  %v60_v23 = vld [vmem:[%s437_s1 + $0x30] sm:$0x3]  ;;  %v32_v28 = vld [vmem:[%s436_s0 + $0xa8] sm:$0xff] }
   0xc   :  { %v122_v57 = vmul.f32 %v97_v47, %v22_v43  ;;  %v99_v62 = vcvt.s32.f32 %v193_v50  ;;  %v100_v63 = vcvt.s32.f32 %v196_v51  ;;  %v101_v0 = vcvt.s32.f32 %v197_v52  ;;  %v33_v29 = vld [vmem:[%s436_s0 + $0xb0] sm:$0xff]  ;;  %v34_v30 = vld [vmem:[%s436_s0 + $0xb8] sm:$0xff]  ;;  %v35_v40 = vld [vmem:[%s436_s0 + $0xc0] sm:$0xff] }
   0xd   :  { %145 = vst.msk [vmem:[%s438_s2 + $0x40] sm:$0xff] %vm136_vm0, %v119_v54  ;;  %146 = vst.msk [vmem:[%s438_s2 + $0x48] sm:$0xff] %vm136_vm0, %v120_v55  ;;  %v200_v2 = vunpack.c.0.s8 %v221_v53  ;;  %v201_v3 = vunpack.c.1.s8 %v221_v53  ;;  %v204_v4 = vunpack.c.2.s8 %v221_v53  ;;  %v205_v5 = vunpack.c.3.s8 %v221_v53 }
   0xe   :  { %147 = vst.msk [vmem:[%s438_s2 + $0x50] sm:$0xff] %vm136_vm0, %v121_v56  ;;  %148 = vst.msk [vmem:[%s438_s2 + $0x58] sm:$0xff] %vm136_vm0, %v122_v57  ;;  %v123_v7 = vmul.f32 %v98_v61, %v23_v48  ;;  %v124_v8 = vmul.f32 %v99_v62, %v24_v58  ;;  %v125_v9 = vmul.f32 %v100_v63, %v25_v59  ;;  %v208_v19 = vunpack.c.0.s8 %v223_v6 }
   0xf   :  { %v126_v10 = vmul.f32 %v101_v0, %v26_v60  ;;  %v102_v14 = vcvt.s32.f32 %v200_v2  ;;  %v103_v15 = vcvt.s32.f32 %v201_v3  ;;  %v104_v16 = vcvt.s32.f32 %v204_v4 }
  0x10   :  { %v105_v17 = vcvt.s32.f32 %v205_v5  ;;  %149 = vst.msk [vmem:[%s438_s2 + $0x60] sm:$0xff] %vm136_vm0, %v123_v7  ;;  %150 = vst.msk [vmem:[%s438_s2 + $0x68] sm:$0xff] %vm136_vm0, %v124_v8  ;;  %v209_v20 = vunpack.c.1.s8 %v223_v6  ;;  %v212_v21 = vunpack.c.2.s8 %v223_v6  ;;  %v213_v22 = vunpack.c.3.s8 %v223_v6 }
  0x11   :  { %151 = vst.msk [vmem:[%s438_s2 + $0x70] sm:$0xff] %vm136_vm0, %v125_v9  ;;  %152 = vst.msk [vmem:[%s438_s2 + $0x78] sm:$0xff] %vm136_vm0, %v126_v10  ;;  %v127_v24 = vmul.f32 %v102_v14, %v27_v1  ;;  %v128_v25 = vmul.f32 %v103_v15, %v28_v11  ;;  %v129_v26 = vmul.f32 %v104_v16, %v29_v12  ;;  %v106_v31 = vcvt.s32.f32 %v208_v19 }
  0x12   :  { %v130_v27 = vmul.f32 %v105_v17, %v30_v13  ;;  %v107_v32 = vcvt.s32.f32 %v209_v20  ;;  %v108_v33 = vcvt.s32.f32 %v212_v21  ;;  %v109_v34 = vcvt.s32.f32 %v213_v22 }
  0x13   :  { %153 = vst.msk [vmem:[%s438_s2 + $0x80] sm:$0xff] %vm136_vm0, %v127_v24  ;;  %154 = vst.msk [vmem:[%s438_s2 + $0x88] sm:$0xff] %vm136_vm0, %v128_v25  ;;  %v85_v35 = vunpack.c.0.s8 %v60_v23  ;;  %v131_v36 = vmul.f32 %v106_v31, %v31_v18 }
  0x14   :  { %155 = vst.msk [vmem:[%s438_s2 + $0x90] sm:$0xff] %vm136_vm0, %v129_v26  ;;  %156 = vst.msk [vmem:[%s438_s2 + $0x98] sm:$0xff] %vm136_vm0, %v130_v27  ;;  %v132_v37 = vmul.f32 %v107_v32, %v32_v28  ;;  %v133_v38 = vmul.f32 %v108_v33, %v33_v29  ;;  %v134_v39 = vmul.f32 %v109_v34, %v34_v30 }
  0x15   :  { %v110_v41 = vcvt.s32.f32 %v85_v35  ;;  %157 = vst.msk [vmem:[%s438_s2 + $0xa0] sm:$0xff] %vm136_vm0, %v131_v36 }
  0x16   :  { %158 = vst.msk [vmem:[%s438_s2 + $0xa8] sm:$0xff] %vm136_vm0, %v132_v37  ;;  %159 = vst.msk [vmem:[%s438_s2 + $0xb0] sm:$0xff] %vm136_vm0, %v133_v38 }
  0x17   :  { %160 = vst.msk [vmem:[%s438_s2 + $0xb8] sm:$0xff] %vm136_vm0, %v134_v39  ;;  %v135_v42 = vmul.f32 %v110_v41, %v35_v40 }
  0x19   :  { %161 = vst.msk [vmem:[%s438_s2 + $0xc0] sm:$0xff] %vm136_vm0, %v135_v42 }

</bundles_post_ra>
